<compile_context>
chip_gen: v6e
topology: v6e:2x2x1
jax: 0.10.0
libtpu: 0.0.40
codegen_flags: <defaults>
</compile_context>

<pallas_src>
import jax
import jax.numpy as jnp
from jax.experimental import pallas as pl
from jax.experimental.pallas import tpu as pltpu


def _round_up(x, m):
    return (x + m - 1) // m * m


def w2v_kernel(idx_smem, emb_hbm, dec_ref, out_ref, x32_ref, xbf_ref, sem):
    """Embedding row-gather (manual DMA) + decoder matmul.

    idx_smem : (N_pad,) int32   scalar-prefetched word indices (SMEM)
    emb_hbm  : (V, D)   f32     embedding table, left in HBM (pl.ANY)
    dec_ref  : (D, tV)  bf16    decoder tile (pre-transposed, lane-dense in V)
    out_ref  : (tN, tV) f32     logits tile
    x32_ref  : (tN, D)  f32     gathered embedding rows (DMA destination)
    xbf_ref  : (tN, D)  bf16    gathered rows cast once per N-tile for the MXU
    sem      : (tN,)            one DMA semaphore per gathered row
    """
    i = pl.program_id(0)          # token (N) tile
    j = pl.program_id(1)          # vocab (V) tile, innermost
    tn = x32_ref.shape[0]

    # Gather the tN embedding rows once per token tile; reuse for every V tile.
    @pl.when(j == 0)
    def _gather():
        @pl.loop(0, tn)
        def _start(r):
            row = idx_smem[i * tn + r]
            pltpu.make_async_copy(
                emb_hbm.at[pl.ds(row, 1), :],
                x32_ref.at[pl.ds(r, 1), :],
                sem.at[r],
            ).start()

        @pl.loop(0, tn)
        def _wait(r):
            pltpu.make_async_copy(
                emb_hbm.at[pl.ds(0, 1), :],
                x32_ref.at[pl.ds(r, 1), :],
                sem.at[r],
            ).wait()

        xbf_ref[...] = x32_ref[...].astype(jnp.bfloat16)

    # (tN, D) bf16 @ (D, tV) bf16 -> (tN, tV) f32 on the MXU.
    out_ref[...] = jnp.dot(xbf_ref[...], dec_ref[...],
                           preferred_element_type=jnp.float32)


def w2v_forward(word, enc_w, dec_w):
    """word: int32 [B, T] -> logits f32 [B, T, V]  (== decoder(encoder(word)))."""
    B, T = word.shape
    V, D = enc_w.shape
    assert dec_w.shape == (V, D)
    N = B * T

    # Lane-dense 128-multiple vocab tiles; 8-multiple token tiles.
    TV = 128 if V <= 512 else 512
    TN = min(128, _round_up(max(N, 8), 8))
    N_pad = _round_up(N, TN)
    V_pad = _round_up(V, TV)

    idx = word.reshape(-1).astype(jnp.int32)
    if N_pad != N:
        idx = jnp.pad(idx, (0, N_pad - N))

    # One-time wrapper transpose + bf16 cast: lane-dense V axis, half the
    # decoder-weight HBM traffic, no in-kernel .T.
    dec_t = dec_w.T.astype(jnp.bfloat16)              # (D, V)
    if V_pad != V:
        dec_t = jnp.pad(dec_t, ((0, 0), (0, V_pad - V)))

    grid = (N_pad // TN, V_pad // TV)

    grid_spec = pltpu.PrefetchScalarGridSpec(
        num_scalar_prefetch=1,
        grid=grid,
        in_specs=[
            pl.BlockSpec(memory_space=pl.ANY),                      # emb table (HBM)
            pl.BlockSpec((D, TV), lambda i, j, idx_ref: (0, j)),    # decoder tile
        ],
        out_specs=pl.BlockSpec((TN, TV), lambda i, j, idx_ref: (i, j)),
        scratch_shapes=[
            pltpu.VMEM((TN, D), jnp.float32),
            pltpu.VMEM((TN, D), jnp.bfloat16),
            pltpu.SemaphoreType.DMA((TN,)),
        ],
    )

    cost = pl.CostEstimate(
        flops=2 * N_pad * V_pad * D,
        transcendentals=0,
        bytes_accessed=(grid[0] * V_pad * D * 2       # decoder weight stream (bf16)
                        + N_pad * D * 4               # gathered embedding rows
                        + N_pad * V_pad * 4           # logits
                        + N_pad * 4),                 # indices
    )

    out = pl.pallas_call(
        w2v_kernel,
        out_shape=jax.ShapeDtypeStruct((N_pad, V_pad), jnp.float32),
        grid_spec=grid_spec,
        compiler_params=pltpu.CompilerParams(
            # Token tiles are independent -> "parallel" (2nd TC on v7x);
            # vocab axis carries the gathered-x reuse (j==0 gate) -> "arbitrary".
            dimension_semantics=("parallel", "arbitrary")),
        cost_estimate=cost,
    )(idx, enc_w.astype(jnp.float32), dec_t)

    return out[:N, :V].reshape(B, T, V)


def init_params(voc_size, emb_dim, key):
    """Match W2VModel.init_emb(): encoder ~ U(-0.5/D, 0.5/D), decoder = 0."""
    initrange = 0.5 / emb_dim
    enc = jax.random.uniform(key, (voc_size, emb_dim),
                             minval=-initrange, maxval=initrange,
                             dtype=jnp.float32)
    dec = jnp.zeros((voc_size, emb_dim), dtype=jnp.float32)
    return enc, dec


if __name__ == "__main__":
    voc_size, emb_dim = 256, 32
    B, T = 2, 8

    key = jax.random.PRNGKey(0)
    k_idx, k_enc, k_dec = jax.random.split(key, 3)

    enc_w, dec_w = init_params(voc_size, emb_dim, k_enc)
    word = jax.random.randint(k_idx, (B, T), 0, voc_size, dtype=jnp.int32)

    # 1) Module-faithful init (decoder == 0): logits must be exactly zero.
    out0 = jax.block_until_ready(w2v_forward(word, enc_w, dec_w))
    assert out0.shape == (B, T, voc_size), out0.shape
    assert jnp.all(out0 == 0.0), "zero-decoder logits should be exactly zero"

    # 2) Non-trivial decoder weights for a numeric check vs pure-JAX reference.
    dec_rand = jax.random.uniform(k_dec, (voc_size, emb_dim),
                                  minval=-0.02, maxval=0.02, dtype=jnp.float32)
    out = jax.block_until_ready(w2v_forward(word, enc_w, dec_rand))

    x_ref = jnp.take(enc_w, word.reshape(-1), axis=0)             # (N, D) f32
    ref = jnp.dot(x_ref.astype(jnp.bfloat16),
                  dec_rand.T.astype(jnp.bfloat16),
                  preferred_element_type=jnp.float32).reshape(B, T, voc_size)
    assert jnp.allclose(out, ref, atol=1e-5, rtol=1e-3), "mismatch vs reference"

    print("KERNEL_OK")
</pallas_src>

<mosaic_0001>
module attributes {stable_mosaic.version = 11 : i64} {
  func.func @w2v_kernel(%arg0: i32, %arg1: i32, %arg2: memref<16xi32, #tpu.memory_space<smem>>, %arg3: memref<256x32xf32, #tpu.memory_space<any>>, %arg4: memref<32x128xbf16, #tpu.memory_space<vmem>>, %arg5: memref<16x128xf32, #tpu.memory_space<vmem>>, %arg6: memref<16x32xf32, #tpu.memory_space<vmem>>, %arg7: memref<16x32xbf16, #tpu.memory_space<vmem>>, %arg8: memref<16x!tpu.dma_semaphore, #tpu.memory_space<semaphore_mem>>) attributes {dimension_semantics = [#tpu.dimension_semantics<parallel>, #tpu.dimension_semantics<arbitrary>], iteration_bounds = array<i64: 1, 2>, scalar_prefetch = 1 : i64, scratch_operands = 3 : i64, tpu.core_type = #tpu.core_type<tc>, window_params = [{}, {transform_indices = @transform_1, window_bounds = array<i64: 32, 128>}, {transform_indices = @transform_2, window_bounds = array<i64: 16, 128>}]} {
    %c0_i32 = arith.constant 0 : i32
    %0 = arith.cmpi eq, %arg1, %c0_i32 : i32
    %1 = arith.extui %0 : i1 to i32
    %c0_i32_0 = arith.constant 0 : i32
    %2 = arith.cmpi ne, %1, %c0_i32_0 : i32
    scf.if %2 {
      %c0_i32_6 = arith.constant 0 : i32
      %c16_i32 = arith.constant 16 : i32
      %7 = arith.addi %c0_i32_6, %c16_i32 : i32
      %c1_i32 = arith.constant 1 : i32
      scf.for %arg9 = %c0_i32_6 to %7 step %c1_i32  : i32 {
        %c1_i32_16 = arith.constant 1 : i32
        %12 = arith.muli %arg9, %c1_i32_16 : i32
        %c0_i32_17 = arith.constant 0 : i32
        %13 = arith.addi %c0_i32_17, %12 : i32
        %c16_i32_18 = arith.constant 16 : i32
        %14 = arith.muli %arg0, %c16_i32_18 : i32
        %15 = arith.addi %14, %13 : i32
        %16 = arith.index_cast %15 : i32 to index
        %17 = memref.load %arg2[%16] : memref<16xi32, #tpu.memory_space<smem>>
        %c0_i32_19 = arith.constant 0 : i32
        %18 = tpu.memref_slice %arg3[%17, %c0_i32_19] : memref<256x32xf32, #tpu.memory_space<any>> -> memref<1x32xf32, #tpu.memory_space<any>>
        %c0_i32_20 = arith.constant 0 : i32
        %19 = tpu.memref_slice %arg6[%13, %c0_i32_20] : memref<16x32xf32, #tpu.memory_space<vmem>> -> memref<1x32xf32, #tpu.memory_space<vmem>>
        %20 = tpu.memref_slice %arg8[%13] : memref<16x!tpu.dma_semaphore, #tpu.memory_space<semaphore_mem>> -> memref<1x!tpu.dma_semaphore, #tpu.memory_space<semaphore_mem>>
        %21 = tpu.memref_squeeze %20 : memref<1x!tpu.dma_semaphore, #tpu.memory_space<semaphore_mem>> -> memref<!tpu.dma_semaphore, #tpu.memory_space<semaphore_mem>>
        tpu.enqueue_dma source(%18 : memref<1x32xf32, #tpu.memory_space<any>>) target(%19 : memref<1x32xf32, #tpu.memory_space<vmem>>) target_semaphore(%21 : memref<!tpu.dma_semaphore, #tpu.memory_space<semaphore_mem>>)
      }
      %c16_i32_7 = arith.constant 16 : i32
      %c0_i32_8 = arith.constant 0 : i32
      %c16_i32_9 = arith.constant 16 : i32
      %8 = arith.addi %c0_i32_8, %c16_i32_9 : i32
      %c1_i32_10 = arith.constant 1 : i32
      scf.for %arg9 = %c0_i32_8 to %8 step %c1_i32_10  : i32 {
        %c1_i32_16 = arith.constant 1 : i32
        %12 = arith.muli %arg9, %c1_i32_16 : i32
        %c0_i32_17 = arith.constant 0 : i32
        %13 = arith.addi %c0_i32_17, %12 : i32
        %c0_i32_18 = arith.constant 0 : i32
        %c0_i32_19 = arith.constant 0 : i32
        %14 = tpu.memref_slice %arg3[%c0_i32_18, %c0_i32_19] : memref<256x32xf32, #tpu.memory_space<any>> -> memref<1x32xf32, #tpu.memory_space<any>>
        %c0_i32_20 = arith.constant 0 : i32
        %15 = tpu.memref_slice %arg6[%13, %c0_i32_20] : memref<16x32xf32, #tpu.memory_space<vmem>> -> memref<1x32xf32, #tpu.memory_space<vmem>>
        %16 = tpu.memref_slice %arg8[%13] : memref<16x!tpu.dma_semaphore, #tpu.memory_space<semaphore_mem>> -> memref<1x!tpu.dma_semaphore, #tpu.memory_space<semaphore_mem>>
        %17 = tpu.memref_squeeze %16 : memref<1x!tpu.dma_semaphore, #tpu.memory_space<semaphore_mem>> -> memref<!tpu.dma_semaphore, #tpu.memory_space<semaphore_mem>>
        tpu.wait_dma2 semaphore(%17 : memref<!tpu.dma_semaphore, #tpu.memory_space<semaphore_mem>>) src(%14 : memref<1x32xf32, #tpu.memory_space<any>>) dst(%15 : memref<1x32xf32, #tpu.memory_space<vmem>>)
      }
      %c16_i32_11 = arith.constant 16 : i32
      %c0_12 = arith.constant 0 : index
      %c0_13 = arith.constant 0 : index
      %9 = vector.load %arg6[%c0_12, %c0_13] : memref<16x32xf32, #tpu.memory_space<vmem>>, vector<16x32xf32>
      %10 = arith.truncf %9 : vector<16x32xf32> to vector<16x32xbf16>
      %c0_14 = arith.constant 0 : index
      %c0_15 = arith.constant 0 : index
      %11 = vector.load %arg7[%c0_14, %c0_15] : memref<16x32xbf16, #tpu.memory_space<vmem>>, vector<16x32xbf16>
      tpu.vector_store %arg7[%c0_14, %c0_15], %10 {strides = array<i32>} : memref<16x32xbf16, #tpu.memory_space<vmem>>, vector<16x32xbf16>,
    } else {
    }
    %c0 = arith.constant 0 : index
    %c0_1 = arith.constant 0 : index
    %3 = vector.load %arg7[%c0, %c0_1] : memref<16x32xbf16, #tpu.memory_space<vmem>>, vector<16x32xbf16>
    %c0_2 = arith.constant 0 : index
    %c0_3 = arith.constant 0 : index
    %4 = vector.load %arg4[%c0_2, %c0_3] : memref<32x128xbf16, #tpu.memory_space<vmem>>, vector<32x128xbf16>
    %cst = arith.constant dense<0.000000e+00> : vector<16x128xf32>
    %5 = tpu.matmul %3, %4, %cst {dimension_numbers = #tpu.dot_dimension_numbers<[1], [0], [0], [1], [0, 0, 1, 1], [], []>} : vector<16x32xbf16>, vector<32x128xbf16>, vector<16x128xf32> -> vector<16x128xf32>
    %c0_4 = arith.constant 0 : index
    %c0_5 = arith.constant 0 : index
    %6 = vector.load %arg5[%c0_4, %c0_5] : memref<16x128xf32, #tpu.memory_space<vmem>>, vector<16x128xf32>
    tpu.vector_store %arg5[%c0_4, %c0_5], %5 {strides = array<i32>} : memref<16x128xf32, #tpu.memory_space<vmem>>, vector<16x128xf32>,
    return
  }
  func.func @transform_1(%arg0: i32, %arg1: i32, %arg2: memref<16xi32, #tpu.memory_space<smem>>) -> (i32, i32) {
    %c0_i32 = arith.constant 0 : i32
    %c0_i32_0 = arith.constant 0 : i32
    return %c0_i32, %arg1 : i32, i32
  }
  func.func @transform_2(%arg0: i32, %arg1: i32, %arg2: memref<16xi32, #tpu.memory_space<smem>>) -> (i32, i32) {
    %c0_i32 = arith.constant 0 : i32
    return %arg0, %arg1 : i32, i32
  }
}

</mosaic_0001>

<bundles_post_ra>
// kernel: tpu_custom_call.1
= control target key start
LH: loop header
LB: loop body
LE: loop exit
PB: predicated region body
PF: predicated region fallthrough
CT: control target
= control target key end

     0   :  { %s987_s0 = inlined_call_operand.vmem [shape: s32[16], index: 0, kind: input, shape index: {}]   ;;  %s988_s1 = inlined_call_operand.vmem [shape: f32[256,32], index: 1, kind: input, shape index: {}]   ;;  %s989_s2 = inlined_call_operand.vmem [shape: bf16[32,256], index: 2, kind: input, shape index: {}]   ;;  %s990_s3 = inlined_call_operand.hbm [shape: f32[16,256], index: 3, kind: output, shape index: {}]  }
   0x1   :  { %s8_s14 = sshll.u32 %s987_s0, 4  ;;  %s9_s14 = int_to_ptr.vmem [resolvable:$true] %s8_s14 }
   0x2   :  { %s707_s15 = scalar_lea.vmem %s9_s14, 16  ;;  %p712_p1 = scmp.lt.s32.totalorder %s9_s14, %s9_s14 }
   0x3   :  { %p708_p0 = scmp.ne.s32.totalorder %s9_s14, %s707_s15  ;;  %p713_p2 = scmp.lt.s32.totalorder %s707_s15, %s707_s15 }
   0x5   :  { %p714_p3 = por %p713_p2, %p712_p1 }
   0x7   :  { %p715_p4 = pnand %p714_p3, %p708_p0 }
   0x9   :  { %718 = shalt.err (!%p715_p4)  }
   0xa   :  { %s817_s16 = smov [#allocation6]  }
   0xb   :  { %11 = dma.vmem_to_smem %s9_s14, 16, %s817_s16, [#allocation5] }
   0xc   :  { %777 = dma.done.wait [#allocation5], 16 }
   0xd   :  { %778 = vsyncadd [#allocation5], 4294967280 }
   0xe   :  { %13 = sfence }
   0xf   :  { %14 = vsyncpa [#allocation9], 0 }
  0x10   :  { %16 = vsyncpa [#allocation9 + $0x1], 0  ;;  %s847_s17 = smov 0   ;;  %s849_s18 = smov 0  }
  0x11   :  { %s851_s0 = smov 0   ;;  %s853_s19 = smov 0  }
  0x12   :  { %s855_s20 = smov 0   ;;  %s857_s21 = smov 0  }
  0x13 LB: > { %s578_s22 = sadd.s32 4294967295, %s807_s21   ;;  %s579_s23 = sadd.s32 4294967294, %s807_s21   ;;  %s807_s21 = sphi %s857_s21, %s22_s21   ;;  %s803_s20 = sphi %s855_s20, %s997_s20   ;;  %s799_s19 = sphi %s853_s19, %s996_s19   ;;  %s795_s0 = sphi %s851_s0, %s995_s0   ;;  %s791_s18 = sphi %s849_s18, %s994_s18   ;;  %s787_s17 = sphi %s847_s17, %s993_s17  }
  0x14   : > { %s31_s24 = sadd.s32 1, %s803_s20  ;;  %s41_s25 = sadd.s32 1, %s795_s0 }
  0x15   : > { %p32_p5 = scmp.ge.s32.totalorder %s31_s24, 2  ;;  %p48_p6 = scmp.ne.s32.totalorder %s795_s0, %s791_s18 }
  0x16   : > { %p49_p7 = scmp.eq.s32.totalorder %s807_s21, 0  ;;  %p80_p8 = scmp.eq.s32.totalorder %s578_s22, 1 }
  0x17   : > { %s999_s24 = smov (%p32_p5, %s31_s24), 0  ;;  %p85_p11 = scmp.ne.s32.totalorder %s791_s18, %s787_s17 }
  0x18   : > { %p50_p9 = por %p49_p7, %p48_p6  ;;  %p886_p10 = por %p80_p8, %p48_p6 }
  0x19   : > { %s38_s27 = ssub.s32 %s803_s20, %s999_s24  ;;  %p86_p13 = scmp.eq.s32.totalorder %s579_s23, 1 }
  0x1a   : > { %p39_p12 = scmp.eq.s32.totalorder %s38_s27, 0  ;;  %p581_p1 = scmp.ge.s32.totalorder %s807_s21, 2 }
  0x1b   : > { %p897_p0 = por %p86_p13, %p85_p11 }
  0x1c   : > { %s895_s28 = scalar_select %p39_p12, %s795_s0, %s41_s25  }
  0x1d   : > { %102 = sbr.rel (%p581_p1) target bundleno = 40 (0x28), region = 16 }
  0x22   : > { %105 = sbr.rel (!%p50_p9) target bundleno = 40 (0x28), region = 20  ;;  %s107_s30 = sand.u32 (%p50_p9), 1, %s795_s0  }
  0x23   : > { %s583_s4 = sshll.u32 (%p50_p9), %s803_s20, 2  ;;  %s582_s5 = sshll.u32 (%p50_p9), %s107_s30, 4 }
  0x24   : > { %s111_s8 = scalar_lea.vmem (%p50_p9), %s989_s2, %s583_s4  ;;  %s109_s9 = scalar_lea.vmem (%p50_p9), [#allocation7], %s582_s5 }
  0x25   : > { %v128_v0 = vld [vmem:[%s111_s8] sm:$0xf] (%p50_p9)  ;;  %v130_v1 = vld [vmem:[%s111_s8 + $0x8] sm:$0xf] (%p50_p9)  ;;  %v132_v2 = vld [vmem:[%s111_s8 + $0x10] sm:$0xf] (%p50_p9) }
  0x26   : > { %129 = vst [vmem:[%s109_s9] sm:$0xf] (%p50_p9), %v128_v0  ;;  %131 = vst [vmem:[%s109_s9 + $0x4] sm:$0xf] (%p50_p9), %v130_v1  ;;  %v134_v3 = vld [vmem:[%s111_s8 + $0x18] sm:$0xf] (%p50_p9) }
  0x27   : > { %133 = vst [vmem:[%s109_s9 + $0x8] sm:$0xf] %v132_v2  ;;  %135 = vst [vmem:[%s109_s9 + $0xc] sm:$0xf] %v134_v3 }
  0x28 PF: > { %p584_p2 = scmp.ge.s32.totalorder %s807_s21, 1  ;;  %p166_p3 = scmp.lt.s32.totalorder %s807_s21, 3 }
  0x2a   : > { %p167_p4 = pnand %p584_p2, %p166_p3 }
  0x2b   : > { %s173_s10 = sand.u32 (!%p167_p4), 1, %s791_s18   ;;  %p587_p5 = scmp.ne.s32.totalorder (!%p167_p4), %s799_s19, 0 }
  0x2c   : > { %170 = sbr.rel (%p167_p4) target bundleno = 303 (0x12f), region = 61  ;;  %s914_s11 = sshll.u32 (!%p167_p4), %s173_s10, 4 }
  0x2d   : > { %s175_s12 = scalar_lea.vmem (!%p167_p4), [#allocation7], %s914_s11  ;;  %s918_s13 = scalar_lea.vmem (!%p167_p4), [#allocation8], %s914_s11 }
  0x31   : > { %197 = sbr.rel (%p587_p5) target bundleno = 81 (0x51), region = 69  ;;  %s809_s14 = smov (!%p587_p5), 0  }
  0x36 LB: >> { %s206_s15 = sld [smem:[#allocation6 + %s811_s14]]  ;;  %s208_s25 = scalar_lea.vmem [#allocation2], %s811_s14  ;;  %s811_s14 = sphi %s809_s14, %s203_s14  }
  0x37   : >> { %s209_s27 = scalar_lea.sflag [#allocation4], %s811_s14 }
  0x3c   : >> { %s207_s23 = scalar_lea.vmem %s988_s1, %s206_s15 }
  0x3d   : >> { %v228_v4 = vld [vmem:[%s207_s23] sm:$0x1] }
  0x3e   : >> { %229 = vst [vmem:[%s208_s25] sm:$0x1] %v228_v4 }
  0x3f   : >> { %255 = vsyncadd %s209_s27, 16  ;;  %s203_s14 = sadd.s32 1, %s811_s14  }
  0x40   : >> { %p200_p6 = scmp.ge.s32.totalorder %s203_s14, 16  }
  0x41   : > { %s813_s30 = smov (%p200_p6), 0  }
  0x42   : > { %202 = sbr.rel (!%p200_p6) target bundleno = 54 (0x36), region = 182 }
  0x47 LB: >> { %s262_s4 = scalar_lea.sflag [#allocation4], %s815_s30  ;;  %s815_s30 = sphi %s813_s30, %s261_s30  }
  0x48   : >> { %779 = dma.done.wait %s262_s4, 16 }
  0x49   : >> { %780 = vsyncadd %s262_s4, 4294967280  ;;  %s261_s30 = sadd.s32 1, %s815_s30  }
  0x4a   : >> { %p258_p7 = scmp.ge.s32.totalorder %s261_s30, 16  }
  0x4b   : > { %v266_v5 = vld [vmem:[#allocation2] sm:$0xff] (%p258_p7)  ;;  %vm276_vm0 = vcmask (%p258_p7), 257024   ;;  %v267_v6 = vld [vmem:[#allocation2 + $0x8] sm:$0xff] (%p258_p7) }
  0x4c   : > { %260 = sbr.rel (!%p258_p7) target bundleno = 71 (0x47), region = 193  ;;  %v614_v7 = vpack.c.bf16 (%p258_p7), %v266_v5, %v266_v5  ;;  %v615_v8 = vpack.c.bf16 (%p258_p7), %v267_v6, %v267_v6 }
  0x4e   : > { %277 = vst.msk [vmem:[#allocation3] sm:$0xf] (%p258_p7), %vm276_vm0, %v614_v7  ;;  %278 = vst.msk [vmem:[#allocation3 + $0x4] sm:$0xf] (%p258_p7), %vm276_vm0, %v615_v8 }
  0x51 PF: > { %v704_v9 = vld [vmem:[%s175_s12 + $0x8] sm:$0xff]   ;;  %v818_v10 = vmov 0.0   ;;  %v705_v11 = vld [vmem:[%s175_s12] sm:$0xff]   ;;  %vm819_vm1 = vmmov 0   ;;  %vm302_vm2 = vcmask 261120   ;;  %s595_s5 = sshll.u32 %s799_s19, 7 }
  0x52   : > { %619 = vmatprep.subr.bf16.mxu0 %v818_v10  ;;  %623 = vmatprep.mubr.msk.bf16.mxu0 %vm819_vm1, %v818_v10  ;;  %s365_s6 = sshll.u32 %s918_s13, 4  ;;  %s934_s9 = scalar_lea.hbm %s990_s3, %s595_s5  ;;  %s936_s6 = int_to_ptr.vmem [resolvable:$true] %s365_s6 }
  0x53   : > { %620 = vmatpush3.bf16.msra.mxu0 %v704_v9  ;;  %s941_s11 = scalar_lea.sflag [#allocation9], %s173_s10  ;;  %s719_s19 = scalar_lea.vmem %s936_s6, 256 }
  0x54   : > { %621 = vmatprep.subr.bf16.mxu0 %v818_v10  ;;  %p720_p8 = scmp.ne.s32.totalorder %s936_s6, %s719_s19  ;;  %s820_s12 = smov [#allocation8]  }
  0x55   : > { %v706_v12 = vld [vmem:[#allocation3] sm:$0xff]   ;;  %s723_s14 = sshll.u32 %s820_s12, 4  ;;  %s724_s14 = int_to_ptr.vmem [resolvable:$false] %s723_s14 }
  0x56   : > { %p721_p9 = pnand %p720_p8, %p886_p10  ;;  %s725_s15 = scalar_lea.vmem %s724_s14, 512 }
  0x57   : > { %622 = vmatpush3.bf16.msra.mxu0 %v705_v11  ;;  %p726_p12 = scmp.lt.s32.totalorder %s936_s6, %s724_s14  ;;  %p727_p13 = scmp.lt.s32.totalorder %s725_s15, %s719_s19 }
  0x58   : > { %p722_p11 = pneg %p721_p9 }
  0x59   : > { %p728_p2 = por %p727_p13, %p726_p12 }
  0x5a   : > { %624 = vmatmul.mubr.msk.bf16.vlgmr.msra.gmra.mxu0 %vm302_vm2, %v706_v12 }
  0x5b   : > { %p729_p3 = pnand %p728_p2, %p722_p11 }
 0x11a   : > { %v340_v13 = vpop.f32.mrf.mxu0 }
 0x11b   : > { %347 = vst [vmem:[%s918_s13] sm:$0xff] %v340_v13 }
 0x11c   : > { %v625_v14 = vpop.f32.mrf.mxu0 }
 0x11e   : > { %v343_v15 = vpop.f32.mrf.mxu0 }
 0x11f   : > { %348 = vst [vmem:[%s918_s13 + $0x8] sm:$0xff] %v343_v15 }
 0x120   : > { %v626_v16 = vpop.f32.mrf.mxu0 }
 0x121   : > { %732 = shalt.err (!%p729_p3)
}
 0x122   : > { %s733_s10 = scalar_lea.hbm %s934_s9, 256  ;;  %s737_s22 = scalar_lea.hbm %s990_s3, 512 }
 0x123   : > { %p734_p4 = scmp.ne.s32.totalorder %s934_s9, %s733_s10  ;;  %p738_p7 = scmp.lt.s32.totalorder %s934_s9, %s990_s3 }
 0x124   : > { %p739_p8 = scmp.lt.s32.totalorder %s737_s22, %s733_s10 }
 0x125   : > { %p735_p5 = pnand %p734_p4, %p886_p10 }
 0x126   : > { %p740_p9 = por %p739_p8, %p738_p7 }
 0x127   : > { %p736_p6 = pneg %p735_p5 }
 0x129   : > { %p741_p11 = pnand %p740_p9, %p736_p6 }
 0x12b   : > { %744 = shalt.err (!%p741_p11)
}
 0x12c   : > { %s821_s27 = smov 128   ;;  %s822_s30 = smov 256  }
 0x12d   : > { %s823_s4 = smov 8  }
 0x12e   : > { %627 = dma.vmem_to_hbm [thread:$0]  (%p886_p10), %s936_s6, 256, %s934_s9, %s941_s11, %s821_s27, %s822_s30, %s823_s4  }
 0x12f PF: > { %s380_s5 = sand.u32 1, %s787_s17   ;;  %p630_p12 = pnand %p581_p1, %p897_p0 }
 0x130   : > { %s381_s7 = scalar_lea.sflag [#allocation9], %s380_s5 }
 0x131   : > { %p631_p13 = pneg %p630_p12 }
 0x133   : > { %782 = dma.done.wait (%p631_p13), %s381_s7, 256  }
 0x134   : > { %784 = vsyncadd (%p631_p13), %s381_s7, 4294967040  ;;  %s22_s21 = sadd.s32 1, %s807_s21   ;;  %s993_s17 = smov %s791_s18 }
 0x135   : > { %p19_p2 = scmp.ge.s32.totalorder %s22_s21, 4   ;;  %s994_s18 = smov %s795_s0 }
 0x136   : > { %s995_s0 = smov %s895_s28  ;;  %s996_s19 = smov %s803_s20 }
 0x137   : > { %s997_s20 = smov %s999_s24  ;;  %21 = sbr.rel (!%p19_p2) target bundleno = 19 (0x13), region = 204 }
 0x13c   :  { %386 = vsyncpa [#allocation9], 1 }
 0x13d   :  { %388 = vsyncpa [#allocation9 + $0x1], 1 }
 0x13e   :  { %389 = vsyncmov [#allocation4] }
 0x141   :  { %s390_s26 = vpop.sfrf %389 }
 0x142   :  { %p598_p10 = scmp.ne.s32.totalorder %s390_s26, 0 }
 0x144   :  { %394 = shalt.err (%p598_p10)  }
 0x145   :  { %396 = vsyncmov [#allocation4 + $0x1] }
 0x148   :  { %s397_s29 = vpop.sfrf %396 }
 0x149   :  { %p599_p0 = scmp.ne.s32.totalorder %s397_s29, 0 }
 0x14b   :  { %401 = shalt.err (%p599_p0)  }
 0x14c   :  { %403 = vsyncmov [#allocation4 + $0x2] }
 0x14f   :  { %s404_s6 = vpop.sfrf %403 }
 0x150   :  { %p600_p1 = scmp.ne.s32.totalorder %s404_s6, 0 }
 0x152   :  { %408 = shalt.err (%p600_p1)  }
 0x153   :  { %410 = vsyncmov [#allocation4 + $0x3] }
 0x156   :  { %s411_s28 = vpop.sfrf %410 }
 0x157   :  { %p601_p3 = scmp.ne.s32.totalorder %s411_s28, 0 }
 0x159   :  { %415 = shalt.err (%p601_p3)  }
 0x15a   :  { %417 = vsyncmov [#allocation4 + $0x4] }
 0x15d   :  { %s418_s21 = vpop.sfrf %417 }
 0x15e   :  { %p602_p4 = scmp.ne.s32.totalorder %s418_s21, 0 }
 0x160   :  { %422 = shalt.err (%p602_p4)  }
 0x161   :  { %424 = vsyncmov [#allocation4 + $0x5] }
 0x164   :  { %s425_s1 = vpop.sfrf %424 }
 0x165   :  { %p603_p5 = scmp.ne.s32.totalorder %s425_s1, 0 }
 0x167   :  { %429 = shalt.err (%p603_p5)  }
 0x168   :  { %431 = vsyncmov [#allocation4 + $0x6] }
 0x16b   :  { %s432_s2 = vpop.sfrf %431 }
 0x16c   :  { %p604_p6 = scmp.ne.s32.totalorder %s432_s2, 0 }
 0x16e   :  { %436 = shalt.err (%p604_p6)  }
 0x16f   :  { %438 = vsyncmov [#allocation4 + $0x7] }
 0x172   :  { %s439_s3 = vpop.sfrf %438 }
 0x173   :  { %p605_p7 = scmp.ne.s32.totalorder %s439_s3, 0 }
 0x175   :  { %443 = shalt.err (%p605_p7)  }
 0x176   :  { %445 = vsyncmov [#allocation4 + $0x8] }
 0x179   :  { %s446_s17 = vpop.sfrf %445 }
 0x17a   :  { %p606_p8 = scmp.ne.s32.totalorder %s446_s17, 0 }
 0x17c   :  { %450 = shalt.err (%p606_p8)  }
 0x17d   :  { %452 = vsyncmov [#allocation4 + $0x9] }
 0x180   :  { %s453_s18 = vpop.sfrf %452 }
 0x181   :  { %p607_p9 = scmp.ne.s32.totalorder %s453_s18, 0 }
 0x183   :  { %457 = shalt.err (%p607_p9)  }
 0x184   :  { %459 = vsyncmov [#allocation4 + $0xa] }
 0x187   :  { %s460_s0 = vpop.sfrf %459 }
 0x188   :  { %p608_p11 = scmp.ne.s32.totalorder %s460_s0, 0 }
 0x18a   :  { %464 = shalt.err (%p608_p11)  }
 0x18b   :  { %466 = vsyncmov [#allocation4 + $0xb] }
 0x18e   :  { %s467_s20 = vpop.sfrf %466 }
 0x18f   :  { %p609_p12 = scmp.ne.s32.totalorder %s467_s20, 0 }
 0x191   :  { %471 = shalt.err (%p609_p12)  }
 0x192   :  { %473 = vsyncmov [#allocation4 + $0xc] }
 0x195   :  { %s474_s24 = vpop.sfrf %473 }
 0x196   :  { %p610_p13 = scmp.ne.s32.totalorder %s474_s24, 0 }
 0x198   :  { %478 = shalt.err (%p610_p13)  }
 0x199   :  { %480 = vsyncmov [#allocation4 + $0xd] }
 0x19c   :  { %s481_s8 = vpop.sfrf %480 }
 0x19d   :  { %p611_p2 = scmp.ne.s32.totalorder %s481_s8, 0 }
 0x19f   :  { %485 = shalt.err (%p611_p2)  }
 0x1a0   :  { %487 = vsyncmov [#allocation4 + $0xe] }
 0x1a3   :  { %s488_s9 = vpop.sfrf %487 }
 0x1a4   :  { %p612_p10 = scmp.ne.s32.totalorder %s488_s9, 0 }
 0x1a6   :  { %492 = shalt.err (%p612_p10)  }
 0x1a7   :  { %494 = vsyncmov [#allocation4 + $0xf] }
 0x1aa   :  { %s495_s11 = vpop.sfrf %494 }
 0x1ab   :  { %p613_p0 = scmp.ne.s32.totalorder %s495_s11, 0 }
 0x1ad   :  { %499 = shalt.err (%p613_p0)  }

</bundles_post_ra>
